<compile_context>
chip_gen: v6e
topology: v6e:2x2x1
jax: 0.10.0
libtpu: 0.0.40
codegen_flags: <defaults>
</compile_context>

<pallas_src>
import functools

import jax
import jax.numpy as jnp
from jax.experimental import pallas as pl
from jax.experimental.pallas import tpu as pltpu

LANE = 128


def _round_up(x, m):
    return ((x + m - 1) // m) * m


def _use_wide_packing():
    """Block-diagonal (256-wide) siamese packing helps the 256x256 MXUs of
    v6e / v7x; on v5e/v4 (128x128 arrays) it would waste half the array on
    zeros, so those chips keep the narrow 128-wide formulation."""
    try:
        kind = jax.devices()[0].device_kind.lower()
    except Exception:
        return True
    return not any(t in kind for t in ("v2", "v3", "v4", "v5"))


# ---------------------------------------------------------------------------
# Kernels
# ---------------------------------------------------------------------------

def _finish(out_ref, d, wc_ref, bc_ref, lane_dense):
    """Classifier reduce + sigmoid + store.  d: (TB, H1P) f32."""
    if lane_dense:
        # Lane reduce -> (TB,) logits, stored as one dense (1, 1, TB) row.
        # The sublane->lane relayout rides the otherwise idle XLU.
        logit = jnp.sum(d * wc_ref[...], axis=-1) + bc_ref[0]
        out_ref[...] = jax.nn.sigmoid(logit)[None, None, :]
    else:
        # Fallback layout: (TB, 1) column (masked stores, known-good lowering).
        logit = jnp.sum(d * wc_ref[...], axis=-1, keepdims=True) + bc_ref[...]
        out_ref[...] = jax.nn.sigmoid(logit)


def _ctt_kernel_wide(x_ref, w1_ref, b1_ref, w2_ref, b2_ref, wc_ref, bc_ref,
                     out_ref, *, lane_dense):
    """v6e / v7x variant: siamese pair packed along lanes, block-diag weights.

    x_ref : (TB, 2*D)      bf16  [t1 | t2]
    w1_ref: (2*D, 2*H0P)   bf16  blockdiag(W1, W1)
    b1_ref: (1, 2*H0P)     bf16
    w2_ref: (2*H0P, 2*H1P) bf16  blockdiag(W2, W2)
    b2_ref: (1, 2*H1P)     f32
    wc_ref: (1, H1P)       f32
    bc_ref: (1, 1)         f32
    """
    h = jnp.dot(x_ref[...], w1_ref[...], preferred_element_type=jnp.float32)
    # bf16 bias + ReLU: result is rounded to bf16 for the next MXU matmul
    # anyway, so this halves VPU work with no numeric change (v6e/v7x VALUs).
    h = jnp.maximum(h.astype(jnp.bfloat16) + b1_ref[...], 0.0)
    e = jnp.dot(h, w2_ref[...], preferred_element_type=jnp.float32)
    e = jnp.maximum(e + b2_ref[...], 0.0)                 # (TB, 2*H1P) f32
    h1p = wc_ref.shape[1]
    d = jnp.abs(e[:, :h1p] - e[:, h1p:])                  # lane-aligned slices
    _finish(out_ref, d, wc_ref, bc_ref, lane_dense)


def _ctt_kernel_narrow(t1_ref, t2_ref, w1_ref, b1_ref, w2_ref, b2_ref, wc_ref,
                       bc_ref, out_ref, *, lane_dense):
    """v5e variant: two 128-wide siamese streams (no concat), f32 elementwise."""

    def summarize(x):
        h = jnp.dot(x, w1_ref[...], preferred_element_type=jnp.float32)
        h = jnp.maximum(h + b1_ref[...], 0.0)
        h = jnp.dot(h.astype(w2_ref.dtype), w2_ref[...],
                    preferred_element_type=jnp.float32)
        return jnp.maximum(h + b2_ref[...], 0.0)

    d = jnp.abs(summarize(t1_ref[...]) - summarize(t2_ref[...]))
    _finish(out_ref, d, wc_ref, bc_ref, lane_dense)


# ---------------------------------------------------------------------------
# Wrapper
# ---------------------------------------------------------------------------

def _choose_tile(B, tile_b):
    tile_b = max(_round_up(tile_b, LANE), LANE)
    full = _round_up(max(B, 1), 16)           # bf16 sublane packing
    if full <= tile_b:
        TB = full
        # Feed both TensorCores on v7x when the batch is big enough to split.
        if TB >= 256:
            TB = _round_up((TB + 1) // 2, LANE)
    else:
        TB = tile_b                            # multiple of 128 by construction
    B_pad = _round_up(max(B, 1), TB)
    return TB, B_pad


def ctt_forward(t1, t2, kernel_params, *, wide, tile_b=2048, lane_dense=True):
    """t1, t2: (B, D) float arrays; kernel_params from prepare_params(..., wide=...)."""
    w1, b1, w2, b2, wc, bc = kernel_params
    B, D = t1.shape
    TB, B_pad = _choose_tile(B, tile_b)
    grid = (B_pad // TB,)

    def pad_rows(a):
        return jnp.pad(a, ((0, B_pad - B), (0, 0))) if B_pad != B else a

    if wide:
        # Pack the siamese pair along the feature/lane axis once, outside the
        # kernel (no per-grid-step VMEM concat copy).
        x = jnp.concatenate([pad_rows(t1), pad_rows(t2)],
                            axis=1).astype(jnp.bfloat16)        # (B_pad, 2D)
        inputs = (x,)
        input_specs = [pl.BlockSpec((TB, 2 * D), lambda i: (i, 0))]
        kernel = functools.partial(_ctt_kernel_wide, lane_dense=lane_dense)
    else:
        inputs = (pad_rows(t1).astype(jnp.bfloat16),
                  pad_rows(t2).astype(jnp.bfloat16))
        input_specs = [pl.BlockSpec((TB, D), lambda i: (i, 0)),
                       pl.BlockSpec((TB, D), lambda i: (i, 0))]
        kernel = functools.partial(_ctt_kernel_narrow, lane_dense=lane_dense)

    weight_specs = [
        pl.BlockSpec(w1.shape, lambda i: (0, 0)),   # W1  (resident)
        pl.BlockSpec(b1.shape, lambda i: (0, 0)),   # b1  (resident)
        pl.BlockSpec(w2.shape, lambda i: (0, 0)),   # W2  (resident)
        pl.BlockSpec(b2.shape, lambda i: (0, 0)),   # b2  (resident)
        pl.BlockSpec(wc.shape, lambda i: (0, 0)),   # Wc row (resident)
        pl.BlockSpec(bc.shape, lambda i: (0, 0)),   # bc  (resident)
    ]
    # NOTE(v6e): if a profile ever shows exposed input DMA, add
    # pipeline_mode=pl.Buffered(3) to the input BlockSpecs above.

    if lane_dense:
        out_shape = jax.ShapeDtypeStruct((grid[0], 1, TB), jnp.float32)
        out_spec = pl.BlockSpec((1, 1, TB), lambda i: (i, 0, 0))
    else:
        out_shape = jax.ShapeDtypeStruct((B_pad, 1), jnp.float32)
        out_spec = pl.BlockSpec((TB, 1), lambda i: (i, 0))

    flops = (2 if wide else 4) * B_pad * (int(w1.size) + int(w2.size))
    bytes_accessed = (sum(int(a.size) * a.dtype.itemsize for a in inputs)
                      + sum(int(a.size) * a.dtype.itemsize for a in kernel_params)
                      + B_pad * 4)

    out = pl.pallas_call(
        kernel,
        out_shape=out_shape,
        grid=grid,
        in_specs=list(input_specs) + weight_specs,
        out_specs=out_spec,
        compiler_params=pltpu.CompilerParams(
            dimension_semantics=("parallel",),          # 2x on v7x (2 TCs)
            vmem_limit_bytes=32 * 1024 * 1024,          # safe on v5e/v6e/v7x
        ),
        cost_estimate=pl.CostEstimate(
            flops=int(flops),
            transcendentals=int(B_pad),                 # sigmoid exp
            bytes_accessed=int(bytes_accessed),
        ),
    )(*inputs, w1, b1, w2, b2, wc, bc)

    if lane_dense:
        out = out.reshape(B_pad)[:B].reshape(B, 1)
    else:
        out = out[:B]
    return out


def ctt_forward_robust(t1, t2, kernel_params, *, wide, tile_b=2048):
    """Prefer the lane-dense output layout; fall back to the (TB, 1) column
    layout if this Mosaic build rejects the sublane->lane relayout."""
    try:
        out = ctt_forward(t1, t2, kernel_params, wide=wide, tile_b=tile_b,
                          lane_dense=True)
        return jax.block_until_ready(out)
    except Exception:
        # TODO(synk): lane-dense store needs a sublane->lane relayout that some
        # Mosaic builds may not support; the fallback keeps the masked (TB,1)
        # stores of the previous (verified) revision.
        out = ctt_forward(t1, t2, kernel_params, wide=wide, tile_b=tile_b,
                          lane_dense=False)
        return jax.block_until_ready(out)


# ---------------------------------------------------------------------------
# Parameters
# ---------------------------------------------------------------------------

def init_params(key, input_dimension, hidden_dimensions):
    """PyTorch-Linear-style init; weights stored pre-transposed (in, out), f32."""
    h0, h1 = hidden_dimensions
    ks = jax.random.split(key, 6)

    def unif(k, shape, fan_in):
        bound = 1.0 / jnp.sqrt(fan_in)
        return jax.random.uniform(k, shape, jnp.float32, -bound, bound)

    w1 = unif(ks[0], (input_dimension, h0), input_dimension)
    b1 = unif(ks[1], (1, h0), input_dimension)
    w2 = unif(ks[2], (h0, h1), h0)
    b2 = unif(ks[3], (1, h1), h0)
    wc = unif(ks[4], (1, h1), h1)      # classifier weight as a row (lane reduce)
    bc = unif(ks[5], (1, 1), h1)
    return (w1, b1, w2, b2, wc, bc)


def prepare_params(params, *, wide):
    """Zero-pad hidden dims to 128 lanes; optionally build the block-diagonal
    siamese packing (256-wide matmuls for v6e/v7x); cast MXU operands to bf16.

    Zero padding is exact: ReLU(0) = 0 and padded Wc lanes are zero, so the
    forward result is unchanged."""
    w1, b1, w2, b2, wc, bc = params
    D, H0 = w1.shape
    H1 = w2.shape[1]
    H0P = _round_up(H0, LANE)
    H1P = _round_up(H1, LANE)

    w1p = jnp.zeros((D, H0P), jnp.float32).at[:, :H0].set(w1)
    b1p = jnp.zeros((1, H0P), jnp.float32).at[:, :H0].set(b1)
    w2p = jnp.zeros((H0P, H1P), jnp.float32).at[:H0, :H1].set(w2)
    b2p = jnp.zeros((1, H1P), jnp.float32).at[:, :H1].set(b2)
    wcp = jnp.zeros((1, H1P), jnp.float32).at[:, :H1].set(wc)

    if not wide:
        return (w1p.astype(jnp.bfloat16), b1p,
                w2p.astype(jnp.bfloat16), b2p, wcp, bc)

    # Block-diagonal siamese packing: x = [t1 | t2] runs both passes in one
    # matmul stream; layer 2 becomes (TB, 256) x (256, 256) -- native MXU shape.
    zA = jnp.zeros_like(w1p)
    w1bd = jnp.concatenate(
        [jnp.concatenate([w1p, zA], axis=1),
         jnp.concatenate([zA, w1p], axis=1)], axis=0)         # (2D, 2*H0P)
    b1bd = jnp.concatenate([b1p, b1p], axis=1)                 # (1, 2*H0P)
    zB = jnp.zeros_like(w2p)
    w2bd = jnp.concatenate(
        [jnp.concatenate([w2p, zB], axis=1),
         jnp.concatenate([zB, w2p], axis=1)], axis=0)          # (2*H0P, 2*H1P)
    b2bd = jnp.concatenate([b2p, b2p], axis=1)                 # (1, 2*H1P)
    return (w1bd.astype(jnp.bfloat16), b1bd.astype(jnp.bfloat16),
            w2bd.astype(jnp.bfloat16), b2bd, wcp, bc)


# ---------------------------------------------------------------------------
# References
# ---------------------------------------------------------------------------

def reference_forward_f32(t1, t2, params):
    """Exact module semantics in f32 (loose check vs the bf16 kernel)."""
    w1, b1, w2, b2, wc, bc = params

    def summ(x):
        h = jnp.maximum(x @ w1 + b1, 0.0)
        return jnp.maximum(h @ w2 + b2, 0.0)

    d = jnp.abs(summ(t1) - summ(t2))
    return jax.nn.sigmoid(jnp.sum(d * wc, axis=-1, keepdims=True) + bc)


def reference_forward_kernel_dtypes(t1, t2, kernel_params, *, wide):
    """Mirror of the kernel's per-path dtype choices (tight check)."""
    w1, b1, w2, b2, wc, bc = kernel_params
    h1p = wc.shape[1]
    if wide:
        x = jnp.concatenate([t1, t2], axis=1).astype(jnp.bfloat16)
        h = jnp.dot(x, w1, preferred_element_type=jnp.float32)
        h = jnp.maximum(h.astype(jnp.bfloat16) + b1, 0.0)
        e = jnp.dot(h, w2, preferred_element_type=jnp.float32)
        e = jnp.maximum(e + b2, 0.0)
        d = jnp.abs(e[:, :h1p] - e[:, h1p:])
    else:
        def summ(x):
            h = jnp.dot(x.astype(jnp.bfloat16), w1,
                        preferred_element_type=jnp.float32)
            h = jnp.maximum(h + b1, 0.0)
            h = jnp.dot(h.astype(jnp.bfloat16), w2,
                        preferred_element_type=jnp.float32)
            return jnp.maximum(h + b2, 0.0)
        d = jnp.abs(summ(t1) - summ(t2))
    return jax.nn.sigmoid(jnp.sum(d * wc, axis=-1, keepdims=True) + bc)


if __name__ == "__main__":
    input_dimension = 32
    hidden_dimensions = (64, 32)
    batch = 8

    key = jax.random.PRNGKey(0)
    k_p, k_t1, k_t2 = jax.random.split(key, 3)

    params = init_params(k_p, input_dimension, hidden_dimensions)
    wide = _use_wide_packing()
    kernel_params = prepare_params(params, wide=wide)

    t1 = jax.random.normal(k_t1, (batch, input_dimension), jnp.float32)
    t2 = jax.random.normal(k_t2, (batch, input_dimension), jnp.float32)

    out = ctt_forward_robust(t1, t2, kernel_params, wide=wide)
    out = jax.block_until_ready(out)
    assert out.shape == (batch, 1)

    # Tight check against a reference using identical bf16/f32 dtype choices.
    ref_tight = reference_forward_kernel_dtypes(t1, t2, kernel_params, wide=wide)
    assert jnp.allclose(out, ref_tight, atol=2e-3, rtol=2e-3), (out, ref_tight)

    # Loose check against the exact f32 PyTorch-module semantics.
    ref_f32 = reference_forward_f32(t1, t2, params)
    assert jnp.allclose(out, ref_f32, atol=5e-2, rtol=5e-2), (out, ref_f32)

    print("KERNEL_OK")
</pallas_src>

<mosaic_0001>
module attributes {stable_mosaic.version = 11 : i64} {
  func.func @_ctt_kernel_wide(%arg0: i32, %arg1: memref<16x64xbf16, #tpu.memory_space<vmem>>, %arg2: memref<64x256xbf16, #tpu.memory_space<vmem>>, %arg3: memref<1x256xbf16, #tpu.memory_space<vmem>>, %arg4: memref<256x256xbf16, #tpu.memory_space<vmem>>, %arg5: memref<1x256xf32, #tpu.memory_space<vmem>>, %arg6: memref<1x128xf32, #tpu.memory_space<vmem>>, %arg7: memref<1x1xf32, #tpu.memory_space<vmem>>, %arg8: memref<1x1x16xf32, #tpu.memory_space<vmem>>) attributes {dimension_semantics = [#tpu.dimension_semantics<parallel>], iteration_bounds = array<i64: 1>, scalar_prefetch = 0 : i64, scratch_operands = 0 : i64, tpu.core_type = #tpu.core_type<tc>, window_params = [{transform_indices = @transform_0, window_bounds = array<i64: 16, 64>}, {pipeline_mode = #tpu.pipeline_mode<synchronous>, transform_indices = @transform_1, window_bounds = array<i64: 64, 256>}, {pipeline_mode = #tpu.pipeline_mode<synchronous>, transform_indices = @transform_2, window_bounds = array<i64: 1, 256>}, {pipeline_mode = #tpu.pipeline_mode<synchronous>, transform_indices = @transform_3, window_bounds = array<i64: 256, 256>}, {pipeline_mode = #tpu.pipeline_mode<synchronous>, transform_indices = @transform_4, window_bounds = array<i64: 1, 256>}, {pipeline_mode = #tpu.pipeline_mode<synchronous>, transform_indices = @transform_5, window_bounds = array<i64: 1, 128>}, {pipeline_mode = #tpu.pipeline_mode<synchronous>, transform_indices = @transform_6, window_bounds = array<i64: 1, 1>}, {transform_indices = @transform_7, window_bounds = array<i64: 1, 1, 16>}]} {
    %c0 = arith.constant 0 : index
    %c0_0 = arith.constant 0 : index
    %0 = vector.load %arg1[%c0, %c0_0] : memref<16x64xbf16, #tpu.memory_space<vmem>>, vector<16x64xbf16>
    %c0_1 = arith.constant 0 : index
    %c0_2 = arith.constant 0 : index
    %1 = vector.load %arg2[%c0_1, %c0_2] : memref<64x256xbf16, #tpu.memory_space<vmem>>, vector<64x256xbf16>
    %cst = arith.constant dense<0.000000e+00> : vector<16x256xf32>
    %2 = tpu.matmul %0, %1, %cst {dimension_numbers = #tpu.dot_dimension_numbers<[1], [0], [0], [1], [0, 0, 1, 1], [], []>} : vector<16x64xbf16>, vector<64x256xbf16>, vector<16x256xf32> -> vector<16x256xf32>
    %3 = arith.truncf %2 : vector<16x256xf32> to vector<16x256xbf16>
    %c0_3 = arith.constant 0 : index
    %c0_4 = arith.constant 0 : index
    %4 = vector.load %arg3[%c0_3, %c0_4] : memref<1x256xbf16, #tpu.memory_space<vmem>>, vector<1x256xbf16>
    %5 = vector.broadcast %4 : vector<1x256xbf16> to vector<16x256xbf16>
    %6 = arith.addf %3, %5 : vector<16x256xbf16>
    %cst_5 = arith.constant 0.000000e+00 : bf16
    %7 = vector.broadcast %cst_5 : bf16 to vector<16x256xbf16>
    %8 = arith.maximumf %6, %7 : vector<16x256xbf16>
    %c0_6 = arith.constant 0 : index
    %c0_7 = arith.constant 0 : index
    %9 = vector.load %arg4[%c0_6, %c0_7] : memref<256x256xbf16, #tpu.memory_space<vmem>>, vector<256x256xbf16>
    %cst_8 = arith.constant dense<0.000000e+00> : vector<16x256xf32>
    %10 = tpu.matmul %8, %9, %cst_8 {dimension_numbers = #tpu.dot_dimension_numbers<[1], [0], [0], [1], [0, 0, 1, 1], [], []>} : vector<16x256xbf16>, vector<256x256xbf16>, vector<16x256xf32> -> vector<16x256xf32>
    %c0_9 = arith.constant 0 : index
    %c0_10 = arith.constant 0 : index
    %11 = vector.load %arg5[%c0_9, %c0_10] : memref<1x256xf32, #tpu.memory_space<vmem>>, vector<1x256xf32>
    %12 = vector.broadcast %11 : vector<1x256xf32> to vector<16x256xf32>
    %13 = arith.addf %10, %12 : vector<16x256xf32>
    %cst_11 = arith.constant 0.000000e+00 : f32
    %14 = vector.broadcast %cst_11 : f32 to vector<16x256xf32>
    %15 = arith.maximumf %13, %14 : vector<16x256xf32>
    %16 = vector.extract_strided_slice %15 {offsets = [0, 0], sizes = [16, 128], strides = [1, 1]} : vector<16x256xf32> to vector<16x128xf32>
    %17 = vector.extract_strided_slice %15 {offsets = [0, 128], sizes = [16, 128], strides = [1, 1]} : vector<16x256xf32> to vector<16x128xf32>
    %18 = arith.subf %16, %17 : vector<16x128xf32>
    %19 = math.absf %18 : vector<16x128xf32>
    %c0_12 = arith.constant 0 : index
    %c0_13 = arith.constant 0 : index
    %20 = vector.load %arg6[%c0_12, %c0_13] : memref<1x128xf32, #tpu.memory_space<vmem>>, vector<1x128xf32>
    %21 = vector.broadcast %20 : vector<1x128xf32> to vector<16x128xf32>
    %22 = arith.mulf %19, %21 : vector<16x128xf32>
    %cst_14 = arith.constant dense<0.000000e+00> : vector<16xf32>
    %23 = vector.multi_reduction <add>, %22, %cst_14 [1] : vector<16x128xf32> to vector<16xf32>
    %c0_15 = arith.constant 0 : index
    %c0_16 = arith.constant 0 : index
    %24 = vector.load %arg7[%c0_15, %c0_16] : memref<1x1xf32, #tpu.memory_space<vmem>>, vector<1x1xf32>
    %25 = vector.shape_cast %24 : vector<1x1xf32> to vector<1xf32>
    %26 = vector.broadcast %25 : vector<1xf32> to vector<16xf32>
    %27 = arith.addf %23, %26 : vector<16xf32>
    %28 = arith.negf %27 : vector<16xf32>
    %29 = math.exp %28 : vector<16xf32>
    %cst_17 = arith.constant 1.000000e+00 : f32
    %30 = vector.broadcast %cst_17 : f32 to vector<16xf32>
    %31 = arith.addf %30, %29 : vector<16xf32>
    %32 = arith.divf %30, %31 : vector<16xf32>
    %33 = vector.shape_cast %32 : vector<16xf32> to vector<1x1x16xf32>
    %c0_18 = arith.constant 0 : index
    %c0_19 = arith.constant 0 : index
    %c0_20 = arith.constant 0 : index
    %34 = vector.load %arg8[%c0_18, %c0_19, %c0_20] : memref<1x1x16xf32, #tpu.memory_space<vmem>>, vector<1x1x16xf32>
    tpu.vector_store %arg8[%c0_18, %c0_19, %c0_20], %33 {strides = array<i32>} : memref<1x1x16xf32, #tpu.memory_space<vmem>>, vector<1x1x16xf32>,
    return
  }
  func.func @transform_0(%arg0: i32) -> (i32, i32) {
    %c0_i32 = arith.constant 0 : i32
    %c0_i32_0 = arith.constant 0 : i32
    return %arg0, %c0_i32 : i32, i32
  }
  func.func @transform_1(%arg0: i32) -> (i32, i32) {
    %c0_i32 = arith.constant 0 : i32
    %c0_i32_0 = arith.constant 0 : i32
    %c0_i32_1 = arith.constant 0 : i32
    return %c0_i32, %c0_i32_0 : i32, i32
  }
  func.func @transform_2(%arg0: i32) -> (i32, i32) {
    %c0_i32 = arith.constant 0 : i32
    %c0_i32_0 = arith.constant 0 : i32
    %c0_i32_1 = arith.constant 0 : i32
    return %c0_i32, %c0_i32_0 : i32, i32
  }
  func.func @transform_3(%arg0: i32) -> (i32, i32) {
    %c0_i32 = arith.constant 0 : i32
    %c0_i32_0 = arith.constant 0 : i32
    %c0_i32_1 = arith.constant 0 : i32
    return %c0_i32, %c0_i32_0 : i32, i32
  }
  func.func @transform_4(%arg0: i32) -> (i32, i32) {
    %c0_i32 = arith.constant 0 : i32
    %c0_i32_0 = arith.constant 0 : i32
    %c0_i32_1 = arith.constant 0 : i32
    return %c0_i32, %c0_i32_0 : i32, i32
  }
  func.func @transform_5(%arg0: i32) -> (i32, i32) {
    %c0_i32 = arith.constant 0 : i32
    %c0_i32_0 = arith.constant 0 : i32
    %c0_i32_1 = arith.constant 0 : i32
    return %c0_i32, %c0_i32_0 : i32, i32
  }
  func.func @transform_6(%arg0: i32) -> (i32, i32) {
    %c0_i32 = arith.constant 0 : i32
    %c0_i32_0 = arith.constant 0 : i32
    %c0_i32_1 = arith.constant 0 : i32
    return %c0_i32, %c0_i32_0 : i32, i32
  }
  func.func @transform_7(%arg0: i32) -> (i32, i32, i32) {
    %c0_i32 = arith.constant 0 : i32
    %c0_i32_0 = arith.constant 0 : i32
    %c0_i32_1 = arith.constant 0 : i32
    return %arg0, %c0_i32, %c0_i32_0 : i32, i32, i32
  }
}

module attributes {stable_mosaic.version = 11 : i64} {
  func.func @_ctt_kernel_wide(%arg0: i32, %arg1: memref<16x64xbf16, #tpu.memory_space<vmem>>, %arg2: memref<64x256xbf16, #tpu.memory_space<vmem>>, %arg3: memref<1x256xbf16, #tpu.memory_space<vmem>>, %arg4: memref<256x256xbf16, #tpu.memory_space<vmem>>, %arg5: memref<1x256xf32, #tpu.memory_space<vmem>>, %arg6: memref<1x128xf32, #tpu.memory_space<vmem>>, %arg7: memref<1x1xf32, #tpu.memory_space<vmem>>, %arg8: memref<16x1xf32, #tpu.memory_space<vmem>>) attributes {dimension_semantics = [#tpu.dimension_semantics<parallel>], iteration_bounds = array<i64: 1>, scalar_prefetch = 0 : i64, scratch_operands = 0 : i64, tpu.core_type = #tpu.core_type<tc>, window_params = [{transform_indices = @transform_0, window_bounds = array<i64: 16, 64>}, {pipeline_mode = #tpu.pipeline_mode<synchronous>, transform_indices = @transform_1, window_bounds = array<i64: 64, 256>}, {pipeline_mode = #tpu.pipeline_mode<synchronous>, transform_indices = @transform_2, window_bounds = array<i64: 1, 256>}, {pipeline_mode = #tpu.pipeline_mode<synchronous>, transform_indices = @transform_3, window_bounds = array<i64: 256, 256>}, {pipeline_mode = #tpu.pipeline_mode<synchronous>, transform_indices = @transform_4, window_bounds = array<i64: 1, 256>}, {pipeline_mode = #tpu.pipeline_mode<synchronous>, transform_indices = @transform_5, window_bounds = array<i64: 1, 128>}, {pipeline_mode = #tpu.pipeline_mode<synchronous>, transform_indices = @transform_6, window_bounds = array<i64: 1, 1>}, {transform_indices = @transform_7, window_bounds = array<i64: 16, 1>}]} {
    %c0 = arith.constant 0 : index
    %c0_0 = arith.constant 0 : index
    %0 = vector.load %arg1[%c0, %c0_0] : memref<16x64xbf16, #tpu.memory_space<vmem>>, vector<16x64xbf16>
    %c0_1 = arith.constant 0 : index
    %c0_2 = arith.constant 0 : index
    %1 = vector.load %arg2[%c0_1, %c0_2] : memref<64x256xbf16, #tpu.memory_space<vmem>>, vector<64x256xbf16>
    %cst = arith.constant dense<0.000000e+00> : vector<16x256xf32>
    %2 = tpu.matmul %0, %1, %cst {dimension_numbers = #tpu.dot_dimension_numbers<[1], [0], [0], [1], [0, 0, 1, 1], [], []>} : vector<16x64xbf16>, vector<64x256xbf16>, vector<16x256xf32> -> vector<16x256xf32>
    %3 = arith.truncf %2 : vector<16x256xf32> to vector<16x256xbf16>
    %c0_3 = arith.constant 0 : index
    %c0_4 = arith.constant 0 : index
    %4 = vector.load %arg3[%c0_3, %c0_4] : memref<1x256xbf16, #tpu.memory_space<vmem>>, vector<1x256xbf16>
    %5 = vector.broadcast %4 : vector<1x256xbf16> to vector<16x256xbf16>
    %6 = arith.addf %3, %5 : vector<16x256xbf16>
    %cst_5 = arith.constant 0.000000e+00 : bf16
    %7 = vector.broadcast %cst_5 : bf16 to vector<16x256xbf16>
    %8 = arith.maximumf %6, %7 : vector<16x256xbf16>
    %c0_6 = arith.constant 0 : index
    %c0_7 = arith.constant 0 : index
    %9 = vector.load %arg4[%c0_6, %c0_7] : memref<256x256xbf16, #tpu.memory_space<vmem>>, vector<256x256xbf16>
    %cst_8 = arith.constant dense<0.000000e+00> : vector<16x256xf32>
    %10 = tpu.matmul %8, %9, %cst_8 {dimension_numbers = #tpu.dot_dimension_numbers<[1], [0], [0], [1], [0, 0, 1, 1], [], []>} : vector<16x256xbf16>, vector<256x256xbf16>, vector<16x256xf32> -> vector<16x256xf32>
    %c0_9 = arith.constant 0 : index
    %c0_10 = arith.constant 0 : index
    %11 = vector.load %arg5[%c0_9, %c0_10] : memref<1x256xf32, #tpu.memory_space<vmem>>, vector<1x256xf32>
    %12 = vector.broadcast %11 : vector<1x256xf32> to vector<16x256xf32>
    %13 = arith.addf %10, %12 : vector<16x256xf32>
    %cst_11 = arith.constant 0.000000e+00 : f32
    %14 = vector.broadcast %cst_11 : f32 to vector<16x256xf32>
    %15 = arith.maximumf %13, %14 : vector<16x256xf32>
    %16 = vector.extract_strided_slice %15 {offsets = [0, 0], sizes = [16, 128], strides = [1, 1]} : vector<16x256xf32> to vector<16x128xf32>
    %17 = vector.extract_strided_slice %15 {offsets = [0, 128], sizes = [16, 128], strides = [1, 1]} : vector<16x256xf32> to vector<16x128xf32>
    %18 = arith.subf %16, %17 : vector<16x128xf32>
    %19 = math.absf %18 : vector<16x128xf32>
    %c0_12 = arith.constant 0 : index
    %c0_13 = arith.constant 0 : index
    %20 = vector.load %arg6[%c0_12, %c0_13] : memref<1x128xf32, #tpu.memory_space<vmem>>, vector<1x128xf32>
    %21 = vector.broadcast %20 : vector<1x128xf32> to vector<16x128xf32>
    %22 = arith.mulf %19, %21 : vector<16x128xf32>
    %cst_14 = arith.constant dense<0.000000e+00> : vector<16xf32>
    %23 = vector.multi_reduction <add>, %22, %cst_14 [1] : vector<16x128xf32> to vector<16xf32>
    %24 = vector.shape_cast %23 : vector<16xf32> to vector<16x1xf32>
    %c0_15 = arith.constant 0 : index
    %c0_16 = arith.constant 0 : index
    %25 = vector.load %arg7[%c0_15, %c0_16] : memref<1x1xf32, #tpu.memory_space<vmem>>, vector<1x1xf32>
    %26 = vector.broadcast %25 : vector<1x1xf32> to vector<16x1xf32>
    %27 = arith.addf %24, %26 : vector<16x1xf32>
    %28 = arith.negf %27 : vector<16x1xf32>
    %29 = math.exp %28 : vector<16x1xf32>
    %cst_17 = arith.constant 1.000000e+00 : f32
    %30 = vector.broadcast %cst_17 : f32 to vector<16x1xf32>
    %31 = arith.addf %30, %29 : vector<16x1xf32>
    %32 = arith.divf %30, %31 : vector<16x1xf32>
    %c0_18 = arith.constant 0 : index
    %c0_19 = arith.constant 0 : index
    %33 = vector.load %arg8[%c0_18, %c0_19] : memref<16x1xf32, #tpu.memory_space<vmem>>, vector<16x1xf32>
    tpu.vector_store %arg8[%c0_18, %c0_19], %32 {strides = array<i32>} : memref<16x1xf32, #tpu.memory_space<vmem>>, vector<16x1xf32>,
    return
  }
  func.func @transform_0(%arg0: i32) -> (i32, i32) {
    %c0_i32 = arith.constant 0 : i32
    %c0_i32_0 = arith.constant 0 : i32
    return %arg0, %c0_i32 : i32, i32
  }
  func.func @transform_1(%arg0: i32) -> (i32, i32) {
    %c0_i32 = arith.constant 0 : i32
    %c0_i32_0 = arith.constant 0 : i32
    %c0_i32_1 = arith.constant 0 : i32
    return %c0_i32, %c0_i32_0 : i32, i32
  }
  func.func @transform_2(%arg0: i32) -> (i32, i32) {
    %c0_i32 = arith.constant 0 : i32
    %c0_i32_0 = arith.constant 0 : i32
    %c0_i32_1 = arith.constant 0 : i32
    return %c0_i32, %c0_i32_0 : i32, i32
  }
  func.func @transform_3(%arg0: i32) -> (i32, i32) {
    %c0_i32 = arith.constant 0 : i32
    %c0_i32_0 = arith.constant 0 : i32
    %c0_i32_1 = arith.constant 0 : i32
    return %c0_i32, %c0_i32_0 : i32, i32
  }
  func.func @transform_4(%arg0: i32) -> (i32, i32) {
    %c0_i32 = arith.constant 0 : i32
    %c0_i32_0 = arith.constant 0 : i32
    %c0_i32_1 = arith.constant 0 : i32
    return %c0_i32, %c0_i32_0 : i32, i32
  }
  func.func @transform_5(%arg0: i32) -> (i32, i32) {
    %c0_i32 = arith.constant 0 : i32
    %c0_i32_0 = arith.constant 0 : i32
    %c0_i32_1 = arith.constant 0 : i32
    return %c0_i32, %c0_i32_0 : i32, i32
  }
  func.func @transform_6(%arg0: i32) -> (i32, i32) {
    %c0_i32 = arith.constant 0 : i32
    %c0_i32_0 = arith.constant 0 : i32
    %c0_i32_1 = arith.constant 0 : i32
    return %c0_i32, %c0_i32_0 : i32, i32
  }
  func.func @transform_7(%arg0: i32) -> (i32, i32) {
    %c0_i32 = arith.constant 0 : i32
    %c0_i32_0 = arith.constant 0 : i32
    return %arg0, %c0_i32 : i32, i32
  }
}

</mosaic_0001>

<bundles_post_ra>
// kernel: tpu_custom_call.1
= control target key start
LH: loop header
LB: loop body
LE: loop exit
PB: predicated region body
PF: predicated region fallthrough
CT: control target
= control target key end

     0   :  { %s844_s0 = inlined_call_operand.hbm [shape: bf16[16,64], index: 0, kind: input, shape index: {}]   ;;  %s845_s1 = inlined_call_operand.hbm [shape: bf16[64,256], index: 1, kind: input, shape index: {}]   ;;  %s846_s2 = inlined_call_operand.vmem [shape: bf16[1,256], index: 2, kind: input, shape index: {}]   ;;  %s847_s3 = inlined_call_operand.hbm [shape: bf16[256,256], index: 3, kind: input, shape index: {}]   ;;  %s848_s4 = inlined_call_operand.vmem [shape: f32[1,256], index: 4, kind: input, shape index: {}]   ;;  %s849_s5 = inlined_call_operand.vmem [shape: f32[1,128], index: 5, kind: input, shape index: {}]   ;;  %s850_s6 = inlined_call_operand.<no memory space> [shape: f32[1,1], index: 6, kind: input, shape index: {}]   ;;  %s851_s7 = inlined_call_operand.hbm [shape: f32[1,1,16], index: 7, kind: output, shape index: {}]  }
   0x1   :  { %v12_v0 = vstv %s850_s6 }
   0x2   :  { %13 = vst [vmem:[#allocation2] sm:$0x1] %v12_v0 }
   0x3   :  { %14 = vsyncpa [#allocation4], 0 }
   0x4   :  { %15 = vsyncpa [#allocation7], 0 }
   0x5   :  { %16 = vsyncpa [#allocation5], 0  ;;  %s756_s26 = smov [#allocation6]  }
   0x6   :  { %s34_s27 = sshll.u32 %s756_s26, 4  ;;  %s35_s27 = int_to_ptr.vmem [resolvable:$true] %s34_s27 }
   0x7   :  { %s678_s28 = scalar_lea.vmem %s35_s27, 1024  ;;  %p683_p1 = scmp.lt.s32.totalorder %s35_s27, %s35_s27 }
   0x8   :  { %p679_p0 = scmp.ne.s32.totalorder %s35_s27, %s678_s28  ;;  %p684_p2 = scmp.lt.s32.totalorder %s678_s28, %s678_s28 }
   0xa   :  { %p685_p3 = por %p684_p2, %p683_p1 }
   0xc   :  { %p686_p4 = pnand %p685_p3, %p679_p0 }
   0xe   :  { %689 = shalt.err (!%p686_p4)
}
   0xf   :  { %s757_s29 = smov 128   ;;  %s758_s30 = smov 8  }
  0x10   :  { %40 = dma.hbm_to_vmem [thread:$0]  %s845_s1, 1024, %s35_s27, [#allocation7], %s757_s29, %s757_s29, %s758_s30  }
  0x11   :  { %s759_s6 = smov [#allocation3]  }
  0x12   :  { %s22_s10 = sshll.u32 %s759_s6, 4  ;;  %s23_s10 = int_to_ptr.vmem [resolvable:$true] %s22_s10 }
  0x13   :  { %s698_s11 = scalar_lea.vmem %s23_s10, 128  ;;  %p703_p6 = scmp.lt.s32.totalorder %s23_s10, %s23_s10 }
  0x14   :  { %p699_p5 = scmp.ne.s32.totalorder %s23_s10, %s698_s11  ;;  %p704_p7 = scmp.lt.s32.totalorder %s698_s11, %s698_s11 }
  0x16   :  { %p705_p8 = por %p704_p7, %p703_p6 }
  0x18   :  { %p706_p9 = pnand %p705_p8, %p699_p5 }
  0x1a   :  { %709 = shalt.err (!%p706_p9)
}
  0x1b   :  { %s760_s12 = smov 64   ;;  %s761_s13 = smov 4  }
  0x1c   :  { %28 = dma.hbm_to_vmem [thread:$0]  %s844_s0, 128, %s23_s10, [#allocation4], %s760_s12, %s760_s12, %s761_s13  }
  0x1d   :  { %s762_s16 = smov [#allocation8]  }
  0x1e   :  { %s48_s17 = sshll.u32 %s762_s16, 4  ;;  %s49_s17 = int_to_ptr.vmem [resolvable:$true] %s48_s17 }
  0x1f   :  { %s718_s1 = scalar_lea.vmem %s49_s17, 4096  ;;  %p723_p11 = scmp.lt.s32.totalorder %s49_s17, %s49_s17 }
  0x20   :  { %p719_p10 = scmp.ne.s32.totalorder %s49_s17, %s718_s1  ;;  %p724_p12 = scmp.lt.s32.totalorder %s718_s1, %s718_s1 }
  0x22   :  { %p725_p13 = por %p724_p12, %p723_p11 }
  0x24   :  { %p726_p0 = pnand %p725_p13, %p719_p10 }
  0x26   :  { %729 = shalt.err (!%p726_p0)
}
  0x27   :  { %54 = dma.hbm_to_vmem [thread:$0]  %s847_s3, 4096, %s49_s17, [#allocation7], %s757_s29, %s757_s29, %s758_s30  }
  0x28   :  { %750 = dma.done.wait [#allocation4], 128  }
  0x29   :  { %751 = vsyncadd [#allocation4], 4294967168 }
  0x2a   :  { %752 = dma.done.wait [#allocation7], 5120  }
  0x2b   :  { %753 = vsyncadd [#allocation7], 4294962176  ;;  %v763_v1 = vmov 0   ;;  %v601_v2 = vld [vmem:[#allocation6 + $0x34] ss:$8 sps:$4 sm:$0xff]   ;;  %vm126_vm0 = vcmask 523264   ;;  %v188_v45 = vlaneseq }
  0x2c   :  { %162 = vmatprep.mubr.bf16.mxu0 %v763_v1  ;;  %599 = vset.pattern.permute.xlu1 %v763_v1  ;;  %v603_v3 = vld [vmem:[#allocation6 + $0x30] ss:$8 sps:$4 sm:$0xff]   ;;  %v604_v4 = vld [vmem:[#allocation6 + $0x24] ss:$8 sps:$4 sm:$0xff]   ;;  %v606_v5 = vld [vmem:[#allocation6 + $0x20] ss:$8 sps:$4 sm:$0xff]  }
  0x2d   :  { %600 = vset.pattern.permute.xlu0 %v763_v1  ;;  %138 = vmatprep.subr.bf16.mxu0 %v601_v2  ;;  %v607_v6 = vld [vmem:[#allocation6 + $0x14] ss:$8 sps:$4 sm:$0xff]   ;;  %v609_v7 = vld [vmem:[#allocation6 + $0x10] ss:$8 sps:$4 sm:$0xff]   ;;  %v610_v10 = vld [vmem:[#allocation6 + $0x4] ss:$8 sps:$4 sm:$0xff]  }
  0x2e   :  { %139 = vmatpush1.bf16.msra.mxu0 %v603_v3  ;;  %v614_v8 = vld [vmem:[#allocation8 + $0x74] ss:$8 sps:$4 sm:$0xff]   ;;  %v616_v9 = vld [vmem:[#allocation8 + $0x70] ss:$8 sps:$4 sm:$0xff]   ;;  %v617_v11 = vld [vmem:[#allocation8 + $0x64] ss:$8 sps:$4 sm:$0xff]  }
  0x2f   :  { %140 = vmatprep.subr.bf16.mxu0 %v604_v4  ;;  %421 = vmatprep.subr.bf16.mxu1 %v614_v8  ;;  %v619_v12 = vld [vmem:[#allocation8 + $0x60] ss:$8 sps:$4 sm:$0xff]   ;;  %v620_v14 = vld [vmem:[#allocation8 + $0x54] ss:$8 sps:$4 sm:$0xff]   ;;  %v622_v16 = vld [vmem:[#allocation8 + $0x50] ss:$8 sps:$4 sm:$0xff]  }
  0x30   :  { %422 = vmatpush1.bf16.msra.mxu1 %v616_v9  ;;  %v612_v13 = vld [vmem:[#allocation6] ss:$8 sps:$4 sm:$0xff]   ;;  %v613_v15 = vld [vmem:[#allocation3] sm:$0xff]   ;;  %v623_v17 = vld [vmem:[#allocation8 + $0x44] ss:$8 sps:$4 sm:$0xff]   ;;  %v822_v47 = vshrl.u32 %v188_v45, 7 }
  0x31   :  { %423 = vmatprep.subr.bf16.mxu1 %v617_v11  ;;  %v625_v18 = vld [vmem:[#allocation8 + $0x40] ss:$8 sps:$4 sm:$0xff]   ;;  %v626_v19 = vld [vmem:[#allocation8 + $0x34] ss:$8 sps:$4 sm:$0xff]   ;;  %v628_v20 = vld [vmem:[#allocation8 + $0x30] ss:$8 sps:$4 sm:$0xff]  }
  0x32   :  { %141 = vmatpush1.bf16.msra.mxu0 %v606_v5  ;;  %v629_v21 = vld [vmem:[#allocation8 + $0x24] ss:$8 sps:$4 sm:$0xff]   ;;  %v631_v22 = vld [vmem:[#allocation8 + $0x20] ss:$8 sps:$4 sm:$0xff]   ;;  %v632_v23 = vld [vmem:[#allocation8 + $0x14] ss:$8 sps:$4 sm:$0xff]  }
  0x33   :  { %142 = vmatprep.subr.bf16.mxu0 %v607_v6  ;;  %v634_v24 = vld [vmem:[#allocation8 + $0x10] ss:$8 sps:$4 sm:$0xff]   ;;  %v635_v25 = vld [vmem:[#allocation8 + $0x4] ss:$8 sps:$4 sm:$0xff]   ;;  %v637_v26 = vld [vmem:[#allocation8] ss:$8 sps:$4 sm:$0xff]  }
  0x34   :  { %424 = vmatpush1.bf16.msra.mxu1 %v619_v12  ;;  %v638_v27 = vld [vmem:[#allocation8 + $0xf4] ss:$8 sps:$4 sm:$0xff]   ;;  %v640_v28 = vld [vmem:[#allocation8 + $0xf0] ss:$8 sps:$4 sm:$0xff]   ;;  %v641_v29 = vld [vmem:[#allocation8 + $0xe4] ss:$8 sps:$4 sm:$0xff]  }
  0x35   :  { %425 = vmatprep.subr.bf16.mxu1 %v620_v14  ;;  %v643_v30 = vld [vmem:[#allocation8 + $0xe0] ss:$8 sps:$4 sm:$0xff]   ;;  %v644_v31 = vld [vmem:[#allocation8 + $0xd4] ss:$8 sps:$4 sm:$0xff]   ;;  %v646_v32 = vld [vmem:[#allocation8 + $0xd0] ss:$8 sps:$4 sm:$0xff]  }
  0x36   :  { %143 = vmatpush1.bf16.msra.mxu0 %v609_v7  ;;  %v647_v33 = vld [vmem:[#allocation8 + $0xc4] ss:$8 sps:$4 sm:$0xff]   ;;  %v649_v34 = vld [vmem:[#allocation8 + $0xc0] ss:$8 sps:$4 sm:$0xff]   ;;  %v650_v35 = vld [vmem:[#allocation8 + $0xb4] ss:$8 sps:$4 sm:$0xff]  }
  0x37   :  { %144 = vmatprep.subr.bf16.mxu0 %v610_v10  ;;  %v652_v36 = vld [vmem:[#allocation8 + $0xb0] ss:$8 sps:$4 sm:$0xff]   ;;  %v653_v37 = vld [vmem:[#allocation8 + $0xa4] ss:$8 sps:$4 sm:$0xff]   ;;  %v655_v38 = vld [vmem:[#allocation8 + $0xa0] ss:$8 sps:$4 sm:$0xff]  }
  0x38   :  { %426 = vmatpush1.bf16.msra.mxu1 %v622_v16  ;;  %v656_v39 = vld [vmem:[#allocation8 + $0x94] ss:$8 sps:$4 sm:$0xff]   ;;  %v658_v40 = vld [vmem:[#allocation8 + $0x90] ss:$8 sps:$4 sm:$0xff]   ;;  %v659_v41 = vld [vmem:[#allocation8 + $0x84] ss:$8 sps:$4 sm:$0xff]  }
  0x39   :  { %427 = vmatprep.subr.bf16.mxu1 %v623_v17  ;;  %v661_v42 = vld [vmem:[#allocation8 + $0x80] ss:$8 sps:$4 sm:$0xff]   ;;  %v764_v43 = vmov 1966171168   ;;  %v204_v55 = vsub.s32 0, %v822_v47  ;;  %v257_v7 = vsub.s32 1, %v822_v47 }
  0x3a   :  { %145 = vmatpush1.bf16.msra.mxu0 %v612_v13  ;;  %v186_v44 = vunpack.c.l.s4 %v764_v43  ;;  %v553_v48 = vld.sshfl [vmem:[%s846_s2] sm:$0x11 pattern:$0x75316420]  ;;  %vm522_vm1 = vcmask 130112   ;;  %vm525_vm2 = vcmask 122880  }
  0x3b   :  { %v184_v50 = vcombine.high %v553_v48, %v553_v48  ;;  %v485_v5 = vld [vmem:[#allocation2] sm:$0x1] }
  0x3c   :  { %428 = vmatpush1.bf16.msra.mxu1 %v625_v18  ;;  %v187_v46 = vunpack.c.0.s8 %v186_v44  ;;  %488 = vperm.xlu1 %599, %v485_v5   ;;  %v249_v6 = vld [vmem:[%s848_s4] sm:$0x3]  ;;  %s765_s4 = smov [#allocation9]  }
  0x3d   :  { %552 = vmatmul.mubr.msk.bf16.vlgmr.msra.gmra.mxu0 %vm126_vm0, %v613_v15  ;;  %429 = vmatprep.subr.bf16.mxu1 %v626_v19  ;;  %v254_v8 = vrot.slane %v249_v6, %v204_v55  ;;  %v258_v9 = vrot.slane %v249_v6, %v257_v7 }
  0x3e   :  { %v190_v49 = vsub.s32 %v187_v46, %v822_v47 }
  0x40   :  { %430 = vmatpush1.bf16.msra.mxu1 %v628_v20  ;;  %v191_v51 = vrot.slane %v553_v48, %v190_v49  ;;  %v198_v52 = vrot.slane %v184_v50, %v190_v49  ;;  %v586_v20 = vld [vmem:[%s849_s5] ss:$0 sm:$0xff]  ;;  %s533_s5 = sshll.u32 %s765_s4, 4  ;;  %s534_s5 = int_to_ptr.vmem [resolvable:$true] %s533_s5 }
  0x41   :  { %431 = vmatprep.subr.bf16.mxu1 %v629_v21  ;;  %s730_s23 = scalar_lea.vmem %s534_s5, 16  ;;  %s734_s24 = scalar_lea.vmem %s534_s5, 32 }
  0x42   :  { %v200_v54 = vpack.i.b16 %v191_v51, %v191_v51  ;;  %v207_v56 = vpack.i.b16 %v198_v52, %v198_v52  ;;  %p731_p1 = scmp.ne.s32.totalorder %s534_s5, %s730_s23  ;;  %p735_p2 = scmp.lt.s32.totalorder %s534_s5, %s534_s5 }
  0x43   :  { %p736_p3 = scmp.lt.s32.totalorder %s734_s24, %s730_s23 }
  0x44   :  { %432 = vmatpush1.bf16.msra.mxu1 %v631_v22  ;;  %v205_v59 = vrot.slane %v200_v54, %v204_v55  ;;  %v212_v61 = vrot.slane %v207_v56, %v204_v55 }
  0x45   :  { %433 = vmatprep.subr.bf16.mxu1 %v632_v23  ;;  %p737_p4 = por %p736_p3, %p735_p2 }
  0x47   :  { %p738_p5 = pnand %p737_p4, %p731_p1 }
  0x48   :  { %434 = vmatpush1.bf16.msra.mxu1 %v634_v24 }
  0x49   :  { %435 = vmatprep.subr.bf16.mxu1 %v635_v25 }
  0x4c   :  { %436 = vmatpush1.bf16.msra.mxu1 %v637_v26 }
  0x4d   :  { %437 = vmatprep.subr.bf16.mxu1 %v638_v27 }
  0x50   :  { %438 = vmatpush2.bf16.msra.mxu1 %v640_v28 }
  0x51   :  { %439 = vmatprep.subr.bf16.mxu1 %v641_v29 }
  0x54   :  { %440 = vmatpush2.bf16.msra.mxu1 %v643_v30 }
  0x55   :  { %441 = vmatprep.subr.bf16.mxu1 %v644_v31 }
  0x58   :  { %442 = vmatpush2.bf16.msra.mxu1 %v646_v32 }
  0x59   :  { %443 = vmatprep.subr.bf16.mxu1 %v647_v33 }
  0x5c   :  { %444 = vmatpush2.bf16.msra.mxu1 %v649_v34 }
  0x5d   :  { %445 = vmatprep.subr.bf16.mxu1 %v650_v35 }
  0x60   :  { %446 = vmatpush2.bf16.msra.mxu1 %v652_v36 }
  0x61   :  { %447 = vmatprep.subr.bf16.mxu1 %v653_v37 }
  0x64   :  { %448 = vmatpush2.bf16.msra.mxu1 %v655_v38 }
  0x65   :  { %449 = vmatprep.subr.bf16.mxu1 %v656_v39 }
  0x68   :  { %450 = vmatpush2.bf16.msra.mxu1 %v658_v40  ;;  %v512_v40 = vand.u32 127, %v188_v45 }
  0x69   :  { %451 = vmatprep.subr.bf16.mxu1 %v659_v41 }
  0x6a   :  { %v517_v41 = vadd.s32 4294967288, %v512_v40 }
  0x6c   :  { %452 = vmatpush2.bf16.msra.mxu1 %v661_v42  ;;  %v515_v42 = vsub.s32 %v512_v40, %v822_v47  ;;  %v520_v43 = vsub.s32 %v517_v41, %v822_v47 }
  0xb7   :  { %v489_v28 = vpop.permute.xlu1 %488 }
  0xb8   :  { %v494_v29 = vrot.slane %v489_v28, %v204_v55 }
  0xfd   :  { %v164_v53 = vpop.f32.mrf.mxu0 }
  0xff   :  { %v166_v57 = vpop.f32.mrf.mxu0 }
 0x101   :  { %v168_v58 = vpop.f32.mrf.mxu0 }
 0x102   :  { %v173_v60 = vpack.c.bf16 %v168_v58, %v164_v53 }
 0x103   :  { %v170_v62 = vpop.f32.mrf.mxu0 }
 0x104   :  { %v174_v63 = vpack.c.bf16 %v170_v62, %v166_v57  ;;  %v213_v0 = vadd.bf16 %v205_v59, %v173_v60 }
 0x106   :  { %v214_v2 = vadd.bf16 %v212_v61, %v174_v63  ;;  %v215_v4 = vmax.bf16 %v763_v1, %v213_v0 }
 0x108   :  { %v216_v3 = vmax.bf16 %v763_v1, %v214_v2 }
 0x10a   :  { %453 = vmatprep.mubr.bf16.mxu1 %v216_v3 }
 0x10b   :  { %454 = vmatmul.mubr.bf16.vlgmr.msra.gmra.mxu1 %v215_v4 }
 0x1cb   :  { %v455_v10 = vpop.f32.mrf.mxu1 }
 0x1cc   :  { %v456_v11 = vadd.f32 %v455_v10, %v254_v8 }
 0x1cd   :  { %v457_v12 = vpop.f32.mrf.mxu1 }
 0x1ce   :  { %v458_v13 = vadd.f32 %v457_v12, %v258_v9  ;;  %v464_v15 = vmax.f32 %v456_v11, 0.0 }
 0x1cf   :  { %v459_v14 = vpop.f32.mrf.mxu1 }
 0x1d0   :  { %v465_v16 = vmax.f32 %v458_v13, 0.0  ;;  %v460_v1 = vadd.f32 %v459_v14, %v254_v8 }
 0x1d1   :  { %v461_v17 = vpop.f32.mrf.mxu1 }
 0x1d2   :  { %v462_v18 = vadd.f32 %v461_v17, %v258_v9  ;;  %v468_v19 = vsub.f32 %v464_v15, %v465_v16  ;;  %v466_v21 = vmax.f32 %v460_v1, 0.0 }
 0x1d4   :  { %v467_v22 = vmax.f32 %v462_v18, 0.0  ;;  %v470_v23 = vand.u32 2147483647, %v468_v19 }
 0x1d6   :  { %v469_v24 = vsub.f32 %v466_v21, %v467_v22  ;;  %v479_v25 = vmul.f32 %v586_v20, %v470_v23 }
 0x1d8   :  { %481 = vadd.xlane.f32.xlu0 %v479_v25  ;;  %v471_v26 = vand.u32 2147483647, %v469_v24 }
 0x1da   :  { %v480_v27 = vmul.f32 %v586_v20, %v471_v26 }
 0x1dc   :  { %483 = vadd.xlane.f32.xlu0 %v480_v27 }
 0x261   :  { %v482_v30 = vpop.xlane.xlu0 %481 }
 0x262   :  { %v495_v31 = vadd.f32 %v494_v29, %v482_v30 }
 0x264   :  { %v587_v32 = vmul.f32 -1.442695, %v495_v31 }
 0x265   :  { %v484_v33 = vpop.xlane.xlu0 %483 }
 0x266   :  { %662 = vpow2.f32 %v587_v32  ;;  %v496_v34 = vadd.f32 %v494_v29, %v484_v33 }
 0x268   :  { %v588_v35 = vmul.f32 -1.442695, %v496_v34 }
 0x26a   :  { %664 = vpow2.f32 %v588_v35 }
 0x273   :  { %v663_v36 = vpop.eup %662 }
 0x274   :  { %v503_v37 = vadd.f32 1.0, %v663_v36 }
 0x276   :  { %666 = vrcp.f32 %v503_v37 }
 0x277   :  { %v665_v38 = vpop.eup %664 }
 0x278   :  { %v504_v39 = vadd.f32 1.0, %v665_v38 }
 0x27a   :  { %668 = vrcp.f32 %v504_v39 }
 0x283   :  { %v667_v44 = vpop.eup %666 }
 0x284   :  { %v516_v48 = vrot.slane %v667_v44, %v515_v42 }
 0x287   :  { %v669_v46 = vpop.eup %668 }
 0x288   :  { %v521_v49 = vrot.slane %v669_v46, %v520_v43 }
 0x28a   :  { %v523_v50 = vsel %vm522_vm1, %v521_v49, %v516_v48 }
 0x28b   :  { %526 = vst.msk [vmem:[#allocation9] sm:$0x1] %vm525_vm2, %v523_v50 }
 0x28c   :  { %741 = shalt.err (!%p738_p5)
}
 0x28d   :  { %536 = dma.vmem_to_hbm [thread:$0]  %s534_s5, 16, %s851_s7, [#allocation5]  }
 0x28e   :  { %754 = dma.done.wait [#allocation5], 16  }
 0x28f   :  { %755 = vsyncadd [#allocation5], 4294967280 }
 0x290   :  { %540 = vsyncpa [#allocation4], 1 }
 0x291   :  { %541 = vsyncpa [#allocation7], 1 }
 0x292   :  { %542 = vsyncpa [#allocation5], 1 }

// kernel: tpu_custom_call.1
= control target key start
LH: loop header
LB: loop body
LE: loop exit
PB: predicated region body
PF: predicated region fallthrough
CT: control target
= control target key end

     0   :  { %s782_s0 = inlined_call_operand.hbm [shape: bf16[16,64], index: 0, kind: input, shape index: {}]   ;;  %s783_s1 = inlined_call_operand.hbm [shape: bf16[64,256], index: 1, kind: input, shape index: {}]   ;;  %s784_s2 = inlined_call_operand.vmem [shape: bf16[1,256], index: 2, kind: input, shape index: {}]   ;;  %s785_s3 = inlined_call_operand.hbm [shape: bf16[256,256], index: 3, kind: input, shape index: {}]   ;;  %s786_s4 = inlined_call_operand.vmem [shape: f32[1,256], index: 4, kind: input, shape index: {}]   ;;  %s787_s5 = inlined_call_operand.vmem [shape: f32[1,128], index: 5, kind: input, shape index: {}]   ;;  %s788_s6 = inlined_call_operand.<no memory space> [shape: f32[1,1], index: 6, kind: input, shape index: {}]   ;;  %s789_s7 = inlined_call_operand.vmem [shape: f32[16,1], index: 7, kind: output, shape index: {}]  }
   0x1   :  { %v12_v0 = vstv %s788_s6 }
   0x2   :  { %13 = vst [vmem:[#allocation2] sm:$0x1] %v12_v0 }
   0x3   :  { %14 = vsyncpa [#allocation4], 0 }
   0x4   :  { %15 = vsyncpa [#allocation6], 0  ;;  %s703_s26 = smov [#allocation5]  }
   0x5   :  { %s33_s27 = sshll.u32 %s703_s26, 4  ;;  %s34_s27 = int_to_ptr.vmem [resolvable:$true] %s33_s27 }
   0x6   :  { %s647_s28 = scalar_lea.vmem %s34_s27, 1024  ;;  %p652_p1 = scmp.lt.s32.totalorder %s34_s27, %s34_s27 }
   0x7   :  { %p648_p0 = scmp.ne.s32.totalorder %s34_s27, %s647_s28  ;;  %p653_p2 = scmp.lt.s32.totalorder %s647_s28, %s647_s28 }
   0x9   :  { %p654_p3 = por %p653_p2, %p652_p1 }
   0xb   :  { %p655_p4 = pnand %p654_p3, %p648_p0 }
   0xd   :  { %658 = shalt.err (!%p655_p4)
}
   0xe   :  { %s704_s29 = smov 128   ;;  %s705_s30 = smov 8  }
   0xf   :  { %39 = dma.hbm_to_vmem [thread:$0]  %s783_s1, 1024, %s34_s27, [#allocation6], %s704_s29, %s704_s29, %s705_s30  }
  0x10   :  { %s706_s6 = smov [#allocation3]  }
  0x11   :  { %s21_s10 = sshll.u32 %s706_s6, 4  ;;  %s22_s10 = int_to_ptr.vmem [resolvable:$true] %s21_s10 }
  0x12   :  { %s667_s11 = scalar_lea.vmem %s22_s10, 128  ;;  %p672_p6 = scmp.lt.s32.totalorder %s22_s10, %s22_s10 }
  0x13   :  { %p668_p5 = scmp.ne.s32.totalorder %s22_s10, %s667_s11  ;;  %p673_p7 = scmp.lt.s32.totalorder %s667_s11, %s667_s11 }
  0x15   :  { %p674_p8 = por %p673_p7, %p672_p6 }
  0x17   :  { %p675_p9 = pnand %p674_p8, %p668_p5 }
  0x19   :  { %678 = shalt.err (!%p675_p9)
}
  0x1a   :  { %s707_s12 = smov 64   ;;  %s708_s13 = smov 4  }
  0x1b   :  { %27 = dma.hbm_to_vmem [thread:$0]  %s782_s0, 128, %s22_s10, [#allocation4], %s707_s12, %s707_s12, %s708_s13  }
  0x1c   :  { %s709_s16 = smov [#allocation7]  }
  0x1d   :  { %s47_s17 = sshll.u32 %s709_s16, 4  ;;  %s48_s17 = int_to_ptr.vmem [resolvable:$true] %s47_s17 }
  0x1e   :  { %s687_s1 = scalar_lea.vmem %s48_s17, 4096  ;;  %p692_p11 = scmp.lt.s32.totalorder %s48_s17, %s48_s17 }
  0x1f   :  { %p688_p10 = scmp.ne.s32.totalorder %s48_s17, %s687_s1  ;;  %p693_p12 = scmp.lt.s32.totalorder %s687_s1, %s687_s1 }
  0x21   :  { %p694_p13 = por %p693_p12, %p692_p11 }
  0x23   :  { %p695_p0 = pnand %p694_p13, %p688_p10 }
  0x25   :  { %698 = shalt.err (!%p695_p0)
}
  0x26   :  { %53 = dma.hbm_to_vmem [thread:$0]  %s785_s3, 4096, %s48_s17, [#allocation6], %s704_s29, %s704_s29, %s705_s30  }
  0x27   :  { %699 = dma.done.wait [#allocation4], 128  }
  0x28   :  { %700 = vsyncadd [#allocation4], 4294967168 }
  0x29   :  { %701 = dma.done.wait [#allocation6], 5120  }
  0x2a   :  { %702 = vsyncadd [#allocation6], 4294962176  ;;  %v710_v1 = vmov 0   ;;  %v570_v2 = vld [vmem:[#allocation5 + $0x34] ss:$8 sps:$4 sm:$0xff]   ;;  %vm125_vm0 = vcmask 523264   ;;  %v187_v45 = vlaneseq }
  0x2b   :  { %161 = vmatprep.mubr.bf16.mxu0 %v710_v1  ;;  %v572_v3 = vld [vmem:[#allocation5 + $0x30] ss:$8 sps:$4 sm:$0xff]   ;;  %137 = vmatprep.subr.bf16.mxu0 %v570_v2  ;;  %v573_v4 = vld [vmem:[#allocation5 + $0x24] ss:$8 sps:$4 sm:$0xff]   ;;  %v575_v5 = vld [vmem:[#allocation5 + $0x20] ss:$8 sps:$4 sm:$0xff]  }
  0x2c   :  { %138 = vmatpush1.bf16.msra.mxu0 %v572_v3  ;;  %v576_v6 = vld [vmem:[#allocation5 + $0x14] ss:$8 sps:$4 sm:$0xff]   ;;  %v578_v7 = vld [vmem:[#allocation5 + $0x10] ss:$8 sps:$4 sm:$0xff]   ;;  %v579_v10 = vld [vmem:[#allocation5 + $0x4] ss:$8 sps:$4 sm:$0xff]  }
  0x2d   :  { %139 = vmatprep.subr.bf16.mxu0 %v573_v4  ;;  %v583_v8 = vld [vmem:[#allocation7 + $0x74] ss:$8 sps:$4 sm:$0xff]   ;;  %v585_v9 = vld [vmem:[#allocation7 + $0x70] ss:$8 sps:$4 sm:$0xff]   ;;  %v586_v11 = vld [vmem:[#allocation7 + $0x64] ss:$8 sps:$4 sm:$0xff]  }
  0x2e   :  { %420 = vmatprep.subr.bf16.mxu1 %v583_v8  ;;  %v588_v12 = vld [vmem:[#allocation7 + $0x60] ss:$8 sps:$4 sm:$0xff]   ;;  %v589_v14 = vld [vmem:[#allocation7 + $0x54] ss:$8 sps:$4 sm:$0xff]   ;;  %v591_v16 = vld [vmem:[#allocation7 + $0x50] ss:$8 sps:$4 sm:$0xff]  }
  0x2f   :  { %421 = vmatpush1.bf16.msra.mxu1 %v585_v9  ;;  %v581_v13 = vld [vmem:[#allocation5] ss:$8 sps:$4 sm:$0xff]   ;;  %v582_v15 = vld [vmem:[#allocation3] sm:$0xff]   ;;  %v592_v17 = vld [vmem:[#allocation7 + $0x44] ss:$8 sps:$4 sm:$0xff]   ;;  %v188_v47 = vshrl.u32 %v187_v45, 7 }
  0x30   :  { %140 = vmatpush1.bf16.msra.mxu0 %v575_v5  ;;  %422 = vmatprep.subr.bf16.mxu1 %v586_v11  ;;  %v594_v18 = vld [vmem:[#allocation7 + $0x40] ss:$8 sps:$4 sm:$0xff]   ;;  %v595_v19 = vld [vmem:[#allocation7 + $0x34] ss:$8 sps:$4 sm:$0xff]   ;;  %v597_v20 = vld [vmem:[#allocation7 + $0x30] ss:$8 sps:$4 sm:$0xff]  }
  0x31   :  { %141 = vmatprep.subr.bf16.mxu0 %v576_v6  ;;  %v598_v21 = vld [vmem:[#allocation7 + $0x24] ss:$8 sps:$4 sm:$0xff]   ;;  %v600_v22 = vld [vmem:[#allocation7 + $0x20] ss:$8 sps:$4 sm:$0xff]   ;;  %v601_v23 = vld [vmem:[#allocation7 + $0x14] ss:$8 sps:$4 sm:$0xff]  }
  0x32   :  { %v603_v24 = vld [vmem:[#allocation7 + $0x10] ss:$8 sps:$4 sm:$0xff]   ;;  %v604_v25 = vld [vmem:[#allocation7 + $0x4] ss:$8 sps:$4 sm:$0xff]   ;;  %v606_v26 = vld [vmem:[#allocation7] ss:$8 sps:$4 sm:$0xff]  }
  0x33   :  { %423 = vmatpush1.bf16.msra.mxu1 %v588_v12  ;;  %v607_v27 = vld [vmem:[#allocation7 + $0xf4] ss:$8 sps:$4 sm:$0xff]   ;;  %v609_v28 = vld [vmem:[#allocation7 + $0xf0] ss:$8 sps:$4 sm:$0xff]   ;;  %v610_v29 = vld [vmem:[#allocation7 + $0xe4] ss:$8 sps:$4 sm:$0xff]  }
  0x34   :  { %142 = vmatpush1.bf16.msra.mxu0 %v578_v7  ;;  %424 = vmatprep.subr.bf16.mxu1 %v589_v14  ;;  %v612_v30 = vld [vmem:[#allocation7 + $0xe0] ss:$8 sps:$4 sm:$0xff]   ;;  %v613_v31 = vld [vmem:[#allocation7 + $0xd4] ss:$8 sps:$4 sm:$0xff]   ;;  %v615_v32 = vld [vmem:[#allocation7 + $0xd0] ss:$8 sps:$4 sm:$0xff]  }
  0x35   :  { %143 = vmatprep.subr.bf16.mxu0 %v579_v10  ;;  %v616_v33 = vld [vmem:[#allocation7 + $0xc4] ss:$8 sps:$4 sm:$0xff]   ;;  %v618_v34 = vld [vmem:[#allocation7 + $0xc0] ss:$8 sps:$4 sm:$0xff]   ;;  %v619_v35 = vld [vmem:[#allocation7 + $0xb4] ss:$8 sps:$4 sm:$0xff]  }
  0x36   :  { %v621_v36 = vld [vmem:[#allocation7 + $0xb0] ss:$8 sps:$4 sm:$0xff]   ;;  %v622_v37 = vld [vmem:[#allocation7 + $0xa4] ss:$8 sps:$4 sm:$0xff]   ;;  %v624_v38 = vld [vmem:[#allocation7 + $0xa0] ss:$8 sps:$4 sm:$0xff]  }
  0x37   :  { %425 = vmatpush1.bf16.msra.mxu1 %v591_v16  ;;  %v625_v39 = vld [vmem:[#allocation7 + $0x94] ss:$8 sps:$4 sm:$0xff]   ;;  %v627_v40 = vld [vmem:[#allocation7 + $0x90] ss:$8 sps:$4 sm:$0xff]   ;;  %v628_v41 = vld [vmem:[#allocation7 + $0x84] ss:$8 sps:$4 sm:$0xff]  }
  0x38   :  { %144 = vmatpush1.bf16.msra.mxu0 %v581_v13  ;;  %426 = vmatprep.subr.bf16.mxu1 %v592_v17  ;;  %v630_v42 = vld [vmem:[#allocation7 + $0x80] ss:$8 sps:$4 sm:$0xff]   ;;  %v711_v43 = vmov 1966171168   ;;  %v203_v55 = vsub.s32 0, %v188_v47  ;;  %v256_v6 = vsub.s32 1, %v188_v47 }
  0x39   :  { %v185_v44 = vunpack.c.l.s4 %v711_v43  ;;  %v524_v48 = vld.sshfl [vmem:[%s784_s2] sm:$0x11 pattern:$0x75316420]  ;;  %vm505_vm1 = vcmask 7168  }
  0x3a   :  { %v183_v50 = vcombine.high %v524_v48, %v524_v48  ;;  %v248_v5 = vld [vmem:[%s786_s4] sm:$0x3] }
  0x3b   :  { %523 = vmatmul.mubr.msk.bf16.vlgmr.msra.gmra.mxu0 %vm125_vm0, %v582_v15  ;;  %427 = vmatpush1.bf16.msra.mxu1 %v594_v18  ;;  %v186_v46 = vunpack.c.0.s8 %v185_v44  ;;  %v253_v7 = vrot.slane %v248_v5, %v203_v55  ;;  %v257_v8 = vrot.slane %v248_v5, %v256_v6 }
  0x3c   :  { %428 = vmatprep.subr.bf16.mxu1 %v595_v19  ;;  %v557_v19 = vld [vmem:[%s787_s5] ss:$0 sm:$0xff] }
  0x3d   :  { %v189_v49 = vsub.s32 %v186_v46, %v188_v47 }
  0x3f   :  { %429 = vmatpush1.bf16.msra.mxu1 %v597_v20  ;;  %v190_v51 = vrot.slane %v524_v48, %v189_v49  ;;  %v197_v52 = vrot.slane %v183_v50, %v189_v49 }
  0x40   :  { %430 = vmatprep.subr.bf16.mxu1 %v598_v21 }
  0x41   :  { %v199_v54 = vpack.i.b16 %v190_v51, %v190_v51  ;;  %v206_v56 = vpack.i.b16 %v197_v52, %v197_v52 }
  0x43   :  { %431 = vmatpush1.bf16.msra.mxu1 %v600_v22  ;;  %v204_v59 = vrot.slane %v199_v54, %v203_v55  ;;  %v211_v61 = vrot.slane %v206_v56, %v203_v55 }
  0x44   :  { %432 = vmatprep.subr.bf16.mxu1 %v601_v23 }
  0x47   :  { %433 = vmatpush1.bf16.msra.mxu1 %v603_v24 }
  0x48   :  { %434 = vmatprep.subr.bf16.mxu1 %v604_v25 }
  0x4b   :  { %435 = vmatpush1.bf16.msra.mxu1 %v606_v26 }
  0x4c   :  { %436 = vmatprep.subr.bf16.mxu1 %v607_v27  ;;  %v558_v27 = vld [vmem:[#allocation2] ss:$0 sm:$0xff] }
  0x4f   :  { %437 = vmatpush2.bf16.msra.mxu1 %v609_v28 }
  0x50   :  { %438 = vmatprep.subr.bf16.mxu1 %v610_v29 }
  0x53   :  { %439 = vmatpush2.bf16.msra.mxu1 %v612_v30 }
  0x54   :  { %440 = vmatprep.subr.bf16.mxu1 %v613_v31 }
  0x57   :  { %441 = vmatpush2.bf16.msra.mxu1 %v615_v32 }
  0x58   :  { %442 = vmatprep.subr.bf16.mxu1 %v616_v33 }
  0x5b   :  { %443 = vmatpush2.bf16.msra.mxu1 %v618_v34 }
  0x5c   :  { %444 = vmatprep.subr.bf16.mxu1 %v619_v35 }
  0x5f   :  { %445 = vmatpush2.bf16.msra.mxu1 %v621_v36 }
  0x60   :  { %446 = vmatprep.subr.bf16.mxu1 %v622_v37 }
  0x63   :  { %447 = vmatpush2.bf16.msra.mxu1 %v624_v38 }
  0x64   :  { %448 = vmatprep.subr.bf16.mxu1 %v625_v39 }
  0x67   :  { %449 = vmatpush2.bf16.msra.mxu1 %v627_v40 }
  0x68   :  { %450 = vmatprep.subr.bf16.mxu1 %v628_v41 }
  0x6b   :  { %451 = vmatpush2.bf16.msra.mxu1 %v630_v42 }
  0xfb   :  { %v163_v53 = vpop.f32.mrf.mxu0 }
  0xfd   :  { %v165_v57 = vpop.f32.mrf.mxu0 }
  0xff   :  { %v167_v58 = vpop.f32.mrf.mxu0 }
 0x100   :  { %v172_v60 = vpack.c.bf16 %v167_v58, %v163_v53 }
 0x101   :  { %v169_v62 = vpop.f32.mrf.mxu0 }
 0x102   :  { %v173_v63 = vpack.c.bf16 %v169_v62, %v165_v57  ;;  %v212_v0 = vadd.bf16 %v204_v59, %v172_v60 }
 0x104   :  { %v213_v2 = vadd.bf16 %v211_v61, %v173_v63  ;;  %v214_v4 = vmax.bf16 %v710_v1, %v212_v0 }
 0x106   :  { %v215_v3 = vmax.bf16 %v710_v1, %v213_v2 }
 0x108   :  { %452 = vmatprep.mubr.bf16.mxu1 %v215_v3 }
 0x109   :  { %453 = vmatmul.mubr.bf16.vlgmr.msra.gmra.mxu1 %v214_v4 }
 0x1c9   :  { %v454_v9 = vpop.f32.mrf.mxu1 }
 0x1ca   :  { %v455_v10 = vadd.f32 %v454_v9, %v253_v7 }
 0x1cb   :  { %v456_v11 = vpop.f32.mrf.mxu1 }
 0x1cc   :  { %v457_v12 = vadd.f32 %v456_v11, %v257_v8  ;;  %v463_v14 = vmax.f32 %v455_v10, 0.0 }
 0x1cd   :  { %v458_v13 = vpop.f32.mrf.mxu1 }
 0x1ce   :  { %v464_v15 = vmax.f32 %v457_v12, 0.0  ;;  %v459_v16 = vadd.f32 %v458_v13, %v253_v7 }
 0x1cf   :  { %v460_v17 = vpop.f32.mrf.mxu1 }
 0x1d0   :  { %v461_v18 = vadd.f32 %v460_v17, %v257_v8  ;;  %v467_v1 = vsub.f32 %v463_v14, %v464_v15  ;;  %v465_v20 = vmax.f32 %v459_v16, 0.0 }
 0x1d2   :  { %v466_v21 = vmax.f32 %v461_v18, 0.0  ;;  %v469_v22 = vand.u32 2147483647, %v467_v1 }
 0x1d4   :  { %v468_v23 = vsub.f32 %v465_v20, %v466_v21  ;;  %v478_v24 = vmul.f32 %v557_v19, %v469_v22 }
 0x1d6   :  { %480 = vadd.xlane.f32.xlu0 %v478_v24  ;;  %v470_v25 = vand.u32 2147483647, %v468_v23 }
 0x1d8   :  { %v479_v26 = vmul.f32 %v557_v19, %v470_v25 }
 0x1da   :  { %482 = vadd.xlane.f32.xlu0 %v479_v26 }
 0x25f   :  { %v481_v28 = vpop.xlane.xlu0 %480 }
 0x260   :  { %v491_v29 = vadd.f32 %v558_v27, %v481_v28 }
 0x262   :  { %v559_v30 = vmul.f32 -1.442695, %v491_v29 }
 0x263   :  { %v483_v31 = vpop.xlane.xlu0 %482 }
 0x264   :  { %631 = vpow2.f32 %v559_v30  ;;  %v492_v32 = vadd.f32 %v558_v27, %v483_v31 }
 0x266   :  { %v560_v33 = vmul.f32 -1.442695, %v492_v32 }
 0x268   :  { %633 = vpow2.f32 %v560_v33 }
 0x271   :  { %v632_v34 = vpop.eup %631 }
 0x272   :  { %v499_v35 = vadd.f32 1.0, %v632_v34 }
 0x274   :  { %635 = vrcp.f32 %v499_v35 }
 0x275   :  { %v634_v36 = vpop.eup %633 }
 0x276   :  { %v500_v37 = vadd.f32 1.0, %v634_v36 }
 0x278   :  { %637 = vrcp.f32 %v500_v37 }
 0x281   :  { %v636_v38 = vpop.eup %635 }
 0x282   :  { %506 = vst.msk [vmem:[%s789_s7] sm:$0xff] %vm505_vm1, %v636_v38 }
 0x285   :  { %v638_v39 = vpop.eup %637 }
 0x286   :  { %507 = vst.msk [vmem:[%s789_s7 + $0x8] sm:$0xff] %vm505_vm1, %v638_v39 }
 0x287   :  { %512 = vsyncpa [#allocation4], 1 }
 0x288   :  { %513 = vsyncpa [#allocation6], 1 }

</bundles_post_ra>
